<compile_context>
chip_gen: v7x
topology: tpu7x:2x2x1
jax: 0.10.0
libtpu: 0.0.40
codegen_flags: <defaults>
</compile_context>

<pallas_src>
import math

import jax
import jax.numpy as jnp
from jax.experimental import pallas as pl
from jax.experimental.pallas import tpu as pltpu


def _round_up(x, m):
    return ((x + m - 1) // m) * m


# --------------------------------------------------------------------------
# Pallas kernel: one batch tile (batch on the lane axis), weights resident.
# --------------------------------------------------------------------------
def critic_mlp_kernel(
    state_t_ref,   # [Ds, TB]   state  tile, transposed (batch on lanes)
    action_t_ref,  # [Da, TB]   action tile, transposed
    w_in_s_ref,    # [F,  Ds]   columns 0:Ds of W_in (torch [out, in] layout)
    w_in_a_ref,    # [F,  Da]   columns Ds: of W_in
    b_in_ref,      # [F,  1]
    w_h1_ref,      # [F,  F]
    b_h1_ref,      # [F,  1]
    w_h2_ref,      # [F,  F]
    b_h2_ref,      # [F,  1]
    w_out_ref,     # [No, F]
    b_out_ref,     # [No, 1]
    q_t_ref,       # [No, TB]   output (lane-dense along batch)
):
    # Fused concat: W_in @ x^T == W_in_s @ state^T + W_in_a @ action^T
    f1 = jnp.dot(w_in_s_ref[...], state_t_ref[...],
                 preferred_element_type=jnp.float32)
    f1 = f1 + jnp.dot(w_in_a_ref[...], action_t_ref[...],
                      preferred_element_type=jnp.float32)
    f1 = jnp.maximum(f1 + b_in_ref[...], 0.0)

    f2 = jnp.dot(w_h1_ref[...], f1, preferred_element_type=jnp.float32)
    f2 = jnp.maximum(f2 + b_h1_ref[...], 0.0)

    f3 = jnp.dot(w_h2_ref[...], f2, preferred_element_type=jnp.float32)
    f3 = jnp.maximum(f3 + b_h2_ref[...], 0.0)

    q = jnp.dot(w_out_ref[...], f3, preferred_element_type=jnp.float32)
    q_t_ref[...] = (q + b_out_ref[...]).astype(q_t_ref.dtype)


# --------------------------------------------------------------------------
# Wrapper (jitted: pad / transpose / slice / squeeze fuse around the kernel)
# --------------------------------------------------------------------------
@jax.jit
def critic_forward(state, action, params):
    """Pallas-backed equivalent of CriticNetwork.forward(state, action)."""
    state = state.astype(jnp.float32)
    action = action.astype(jnp.float32)

    B, Ds = state.shape
    Da = action.shape[1]
    F = params["w_h1"].shape[0]
    No = params["w_out"].shape[0]

    # ---- batch tiling ----------------------------------------------------
    # Big tiles to amortize the ~0.35us/step grid overhead; for large batches
    # keep >= 2 grid steps so the "parallel" axis can split across the two
    # TensorCores of a v7x chip (no-op on v5e/v6e).
    if B <= 1024:
        TB = _round_up(B, 8)                      # single tile
    else:
        n_tiles = max(2, -(-B // 2048))           # >=2 tiles, <=2048 rows/tile
        TB = _round_up(-(-B // n_tiles), 256)     # lane-aligned tile
    B_pad = _round_up(B, TB)
    grid = (B_pad // TB,)

    # One-off layout plumbing (fused under jit, ~B*56 bytes): present the
    # inputs with batch on the lane axis so the kernel is pure standard-
    # orientation matmuls and the output is lane-dense.
    state_t = state.T                              # [Ds, B]
    action_t = action.T                            # [Da, B]
    if B_pad != B:
        state_t = jnp.pad(state_t, ((0, 0), (0, B_pad - B)))
        action_t = jnp.pad(action_t, ((0, 0), (0, B_pad - B)))

    def act_spec(rows):                            # batch-tiled activations
        return pl.BlockSpec((rows, TB), lambda i: (0, i))

    def resident(shape):
        # Constant block index -> DMA'd once, reused for every batch tile.
        # Single-buffered (no point double-buffering a never-changing block).
        return pl.BlockSpec(shape, lambda i: (0, 0),
                            pipeline_mode=pl.Buffered(1))

    flops = 2 * B_pad * ((Ds + Da) * F + 2 * F * F + F * No)
    bytes_accessed = 4 * (
        B_pad * (Ds + Da + No)                     # activations in / q out
        + (Ds + Da) * F + 2 * F * F + No * F       # weights
        + 3 * F + No                               # biases
    )

    # VMEM guard (matters when n_features is scaled up, esp. v7x's 64 MiB):
    # raise the scoped limit only if the resident working set needs it.
    weight_vmem = 4 * ((Ds + Da) * F + 2 * F * F + No * F + 3 * F + No)
    act_vmem = 4 * TB * (2 * (Ds + Da) + 4 * F + 2 * No)   # dbuf acts + temps
    vmem_needed = weight_vmem + act_vmem + (2 << 20)
    vmem_limit = int(vmem_needed) if vmem_needed > (16 << 20) else None

    q_t = pl.pallas_call(
        critic_mlp_kernel,
        out_shape=jax.ShapeDtypeStruct((No, B_pad), jnp.float32),
        grid=grid,
        in_specs=[
            act_spec(Ds),            # state^T
            act_spec(Da),            # action^T
            resident((F, Ds)),       # w_in_s
            resident((F, Da)),       # w_in_a
            resident((F, 1)),        # b_in
            resident((F, F)),        # w_h1
            resident((F, 1)),        # b_h1
            resident((F, F)),        # w_h2
            resident((F, 1)),        # b_h2
            resident((No, F)),       # w_out
            resident((No, 1)),       # b_out
        ],
        out_specs=pl.BlockSpec((No, TB), lambda i: (0, i)),
        compiler_params=pltpu.CompilerParams(
            dimension_semantics=("parallel",),
            vmem_limit_bytes=vmem_limit),
        cost_estimate=pl.CostEstimate(
            flops=flops, transcendentals=0, bytes_accessed=bytes_accessed),
    )(
        state_t, action_t,
        params["w_in_s"], params["w_in_a"], params["b_in"],
        params["w_h1"], params["b_h1"],
        params["w_h2"], params["b_h2"],
        params["w_out"], params["b_out"],
    )

    q = q_t[:, :B].T                 # (B, n_out)
    # torch.squeeze(q): drop all size-1 dims (n_out == 1 -> shape (B,)).
    return jnp.squeeze(q)


# --------------------------------------------------------------------------
# Pure-JAX reference (mirrors the PyTorch forward exactly).
# --------------------------------------------------------------------------
def critic_forward_ref(state, action, params):
    x = jnp.concatenate(
        [state.astype(jnp.float32), action.astype(jnp.float32)], axis=1)
    w_in = jnp.concatenate([params["w_in_s"], params["w_in_a"]], axis=1)
    f1 = jax.nn.relu(x @ w_in.T + params["b_in"][:, 0])
    f2 = jax.nn.relu(f1 @ params["w_h1"].T + params["b_h1"][:, 0])
    f3 = jax.nn.relu(f2 @ params["w_h2"].T + params["b_h2"][:, 0])
    q = f3 @ params["w_out"].T + params["b_out"][:, 0]
    return jnp.squeeze(q)


# --------------------------------------------------------------------------
# Deterministic parameter init matching the PyTorch module's __init__.
# Weights are stored in PyTorch's native [out, in] layout (no per-call
# repacking / padding needed by the kernel).
# --------------------------------------------------------------------------
def init_critic_params(key, state_dim, action_dim, n_features, n_output):
    n_input = state_dim + action_dim
    gain_relu = math.sqrt(2.0)     # nn.init.calculate_gain('relu')
    gain_lin = 1.0                 # nn.init.calculate_gain('linear')
    ks = jax.random.split(key, 8)

    def xavier(k, fan_out, fan_in, gain):
        bound = gain * math.sqrt(6.0 / (fan_in + fan_out))
        return jax.random.uniform(k, (fan_out, fan_in), jnp.float32,
                                  minval=-bound, maxval=bound)

    def bias(k, fan_in, fan_out):
        # PyTorch nn.Linear default bias init: U(-1/sqrt(fan_in), +1/sqrt(fan_in))
        bound = 1.0 / math.sqrt(fan_in)
        return jax.random.uniform(k, (fan_out, 1), jnp.float32,
                                  minval=-bound, maxval=bound)

    # Single Xavier init over the full [F, n_input] input layer, then split
    # columns so the kernel can consume state/action without a concat.
    w_in = xavier(ks[0], n_features, n_input, gain_relu)
    return {
        "w_in_s": w_in[:, :state_dim],
        "w_in_a": w_in[:, state_dim:],
        "b_in":   bias(ks[1], n_input, n_features),
        "w_h1":   xavier(ks[2], n_features, n_features, gain_relu),
        "b_h1":   bias(ks[3], n_features, n_features),
        "w_h2":   xavier(ks[4], n_features, n_features, gain_relu),
        "b_h2":   bias(ks[5], n_features, n_features),
        "w_out":  xavier(ks[6], n_output, n_features, gain_lin),
        "b_out":  bias(ks[7], n_features, n_output),
    }


if __name__ == "__main__":
    # Shapes consistent with the module:
    #   input_shape[-1] = state_dim + action_dim, output_shape = (1,)
    state_dim, action_dim, n_features, n_output = 10, 4, 32, 1

    key = jax.random.PRNGKey(0)
    k_state, k_action, k_params = jax.random.split(key, 3)
    params = init_critic_params(k_params, state_dim, action_dim,
                                n_features, n_output)

    # Small batch (single tile) and large batch (multi-tile, "parallel" grid).
    for batch in (2, 2048):
        ks = jax.random.fold_in(k_state, batch)
        ka = jax.random.fold_in(k_action, batch)
        state = jax.random.normal(ks, (batch, state_dim), jnp.float32)
        action = jax.random.normal(ka, (batch, action_dim), jnp.float32)

        q = jax.block_until_ready(critic_forward(state, action, params))
        assert q.shape == (batch,), q.shape
        assert bool(jnp.all(jnp.isfinite(q)))

        q_ref = critic_forward_ref(state, action, params)
        assert bool(jnp.allclose(q, q_ref, rtol=1e-4, atol=1e-4)), (
            float(jnp.max(jnp.abs(q - q_ref))))

    print("KERNEL_OK")
</pallas_src>

<mosaic_0001>
module attributes {stable_mosaic.version = 11 : i64} {
  func.func @critic_mlp_kernel(%arg0: i32, %arg1: memref<10x8xf32, #tpu.memory_space<vmem>>, %arg2: memref<4x8xf32, #tpu.memory_space<vmem>>, %arg3: memref<32x10xf32, #tpu.memory_space<vmem>>, %arg4: memref<32x4xf32, #tpu.memory_space<vmem>>, %arg5: memref<32x1xf32, #tpu.memory_space<vmem>>, %arg6: memref<32x32xf32, #tpu.memory_space<vmem>>, %arg7: memref<32x1xf32, #tpu.memory_space<vmem>>, %arg8: memref<32x32xf32, #tpu.memory_space<vmem>>, %arg9: memref<32x1xf32, #tpu.memory_space<vmem>>, %arg10: memref<1x32xf32, #tpu.memory_space<vmem>>, %arg11: memref<1x1xf32, #tpu.memory_space<vmem>>, %arg12: memref<1x8xf32, #tpu.memory_space<vmem>>) attributes {dimension_semantics = [#tpu.dimension_semantics<parallel>], iteration_bounds = array<i64: 1>, scalar_prefetch = 0 : i64, scratch_operands = 0 : i64, tpu.core_type = #tpu.core_type<tc>, window_params = [{transform_indices = @transform_0, window_bounds = array<i64: 10, 8>}, {transform_indices = @transform_1, window_bounds = array<i64: 4, 8>}, {pipeline_mode = #tpu.pipeline_mode<synchronous>, transform_indices = @transform_2, window_bounds = array<i64: 32, 10>}, {pipeline_mode = #tpu.pipeline_mode<synchronous>, transform_indices = @transform_3, window_bounds = array<i64: 32, 4>}, {pipeline_mode = #tpu.pipeline_mode<synchronous>, transform_indices = @transform_4, window_bounds = array<i64: 32, 1>}, {pipeline_mode = #tpu.pipeline_mode<synchronous>, transform_indices = @transform_5, window_bounds = array<i64: 32, 32>}, {pipeline_mode = #tpu.pipeline_mode<synchronous>, transform_indices = @transform_6, window_bounds = array<i64: 32, 1>}, {pipeline_mode = #tpu.pipeline_mode<synchronous>, transform_indices = @transform_7, window_bounds = array<i64: 32, 32>}, {pipeline_mode = #tpu.pipeline_mode<synchronous>, transform_indices = @transform_8, window_bounds = array<i64: 32, 1>}, {pipeline_mode = #tpu.pipeline_mode<synchronous>, transform_indices = @transform_9, window_bounds = array<i64: 1, 32>}, {pipeline_mode = #tpu.pipeline_mode<synchronous>, transform_indices = @transform_10, window_bounds = array<i64: 1, 1>}, {transform_indices = @transform_11, window_bounds = array<i64: 1, 8>}]} {
    %c0 = arith.constant 0 : index
    %c0_0 = arith.constant 0 : index
    %0 = vector.load %arg3[%c0, %c0_0] : memref<32x10xf32, #tpu.memory_space<vmem>>, vector<32x10xf32>
    %c0_1 = arith.constant 0 : index
    %c0_2 = arith.constant 0 : index
    %1 = vector.load %arg1[%c0_1, %c0_2] : memref<10x8xf32, #tpu.memory_space<vmem>>, vector<10x8xf32>
    %cst = arith.constant dense<0.000000e+00> : vector<32x8xf32>
    %2 = tpu.matmul %0, %1, %cst {dimension_numbers = #tpu.dot_dimension_numbers<[1], [0], [0], [1], [0, 0, 1, 1], [], []>} : vector<32x10xf32>, vector<10x8xf32>, vector<32x8xf32> -> vector<32x8xf32>
    %c0_3 = arith.constant 0 : index
    %c0_4 = arith.constant 0 : index
    %3 = vector.load %arg4[%c0_3, %c0_4] : memref<32x4xf32, #tpu.memory_space<vmem>>, vector<32x4xf32>
    %c0_5 = arith.constant 0 : index
    %c0_6 = arith.constant 0 : index
    %4 = vector.load %arg2[%c0_5, %c0_6] : memref<4x8xf32, #tpu.memory_space<vmem>>, vector<4x8xf32>
    %cst_7 = arith.constant dense<0.000000e+00> : vector<32x8xf32>
    %5 = tpu.matmul %3, %4, %cst_7 {dimension_numbers = #tpu.dot_dimension_numbers<[1], [0], [0], [1], [0, 0, 1, 1], [], []>} : vector<32x4xf32>, vector<4x8xf32>, vector<32x8xf32> -> vector<32x8xf32>
    %6 = arith.addf %2, %5 : vector<32x8xf32>
    %c0_8 = arith.constant 0 : index
    %c0_9 = arith.constant 0 : index
    %7 = vector.load %arg5[%c0_8, %c0_9] : memref<32x1xf32, #tpu.memory_space<vmem>>, vector<32x1xf32>
    %8 = vector.broadcast %7 : vector<32x1xf32> to vector<32x8xf32>
    %9 = arith.addf %6, %8 : vector<32x8xf32>
    %cst_10 = arith.constant 0.000000e+00 : f32
    %10 = vector.broadcast %cst_10 : f32 to vector<32x8xf32>
    %11 = arith.maximumf %9, %10 : vector<32x8xf32>
    %c0_11 = arith.constant 0 : index
    %c0_12 = arith.constant 0 : index
    %12 = vector.load %arg6[%c0_11, %c0_12] : memref<32x32xf32, #tpu.memory_space<vmem>>, vector<32x32xf32>
    %cst_13 = arith.constant dense<0.000000e+00> : vector<32x8xf32>
    %13 = tpu.matmul %12, %11, %cst_13 {dimension_numbers = #tpu.dot_dimension_numbers<[1], [0], [0], [1], [0, 0, 1, 1], [], []>} : vector<32x32xf32>, vector<32x8xf32>, vector<32x8xf32> -> vector<32x8xf32>
    %c0_14 = arith.constant 0 : index
    %c0_15 = arith.constant 0 : index
    %14 = vector.load %arg7[%c0_14, %c0_15] : memref<32x1xf32, #tpu.memory_space<vmem>>, vector<32x1xf32>
    %15 = vector.broadcast %14 : vector<32x1xf32> to vector<32x8xf32>
    %16 = arith.addf %13, %15 : vector<32x8xf32>
    %cst_16 = arith.constant 0.000000e+00 : f32
    %17 = vector.broadcast %cst_16 : f32 to vector<32x8xf32>
    %18 = arith.maximumf %16, %17 : vector<32x8xf32>
    %c0_17 = arith.constant 0 : index
    %c0_18 = arith.constant 0 : index
    %19 = vector.load %arg8[%c0_17, %c0_18] : memref<32x32xf32, #tpu.memory_space<vmem>>, vector<32x32xf32>
    %cst_19 = arith.constant dense<0.000000e+00> : vector<32x8xf32>
    %20 = tpu.matmul %19, %18, %cst_19 {dimension_numbers = #tpu.dot_dimension_numbers<[1], [0], [0], [1], [0, 0, 1, 1], [], []>} : vector<32x32xf32>, vector<32x8xf32>, vector<32x8xf32> -> vector<32x8xf32>
    %c0_20 = arith.constant 0 : index
    %c0_21 = arith.constant 0 : index
    %21 = vector.load %arg9[%c0_20, %c0_21] : memref<32x1xf32, #tpu.memory_space<vmem>>, vector<32x1xf32>
    %22 = vector.broadcast %21 : vector<32x1xf32> to vector<32x8xf32>
    %23 = arith.addf %20, %22 : vector<32x8xf32>
    %cst_22 = arith.constant 0.000000e+00 : f32
    %24 = vector.broadcast %cst_22 : f32 to vector<32x8xf32>
    %25 = arith.maximumf %23, %24 : vector<32x8xf32>
    %c0_23 = arith.constant 0 : index
    %c0_24 = arith.constant 0 : index
    %26 = vector.load %arg10[%c0_23, %c0_24] : memref<1x32xf32, #tpu.memory_space<vmem>>, vector<1x32xf32>
    %cst_25 = arith.constant dense<0.000000e+00> : vector<1x8xf32>
    %27 = tpu.matmul %26, %25, %cst_25 {dimension_numbers = #tpu.dot_dimension_numbers<[1], [0], [0], [1], [0, 0, 1, 1], [], []>} : vector<1x32xf32>, vector<32x8xf32>, vector<1x8xf32> -> vector<1x8xf32>
    %c0_26 = arith.constant 0 : index
    %c0_27 = arith.constant 0 : index
    %28 = vector.load %arg11[%c0_26, %c0_27] : memref<1x1xf32, #tpu.memory_space<vmem>>, vector<1x1xf32>
    %29 = vector.broadcast %28 : vector<1x1xf32> to vector<1x8xf32>
    %30 = arith.addf %27, %29 : vector<1x8xf32>
    %c0_28 = arith.constant 0 : index
    %c0_29 = arith.constant 0 : index
    %31 = vector.load %arg12[%c0_28, %c0_29] : memref<1x8xf32, #tpu.memory_space<vmem>>, vector<1x8xf32>
    tpu.vector_store %arg12[%c0_28, %c0_29], %30 {strides = array<i32>} : memref<1x8xf32, #tpu.memory_space<vmem>>, vector<1x8xf32>,
    return
  }
  func.func @transform_0(%arg0: i32) -> (i32, i32) {
    %c0_i32 = arith.constant 0 : i32
    %c0_i32_0 = arith.constant 0 : i32
    return %c0_i32, %arg0 : i32, i32
  }
  func.func @transform_1(%arg0: i32) -> (i32, i32) {
    %c0_i32 = arith.constant 0 : i32
    %c0_i32_0 = arith.constant 0 : i32
    return %c0_i32, %arg0 : i32, i32
  }
  func.func @transform_2(%arg0: i32) -> (i32, i32) {
    %c0_i32 = arith.constant 0 : i32
    %c0_i32_0 = arith.constant 0 : i32
    %c0_i32_1 = arith.constant 0 : i32
    return %c0_i32, %c0_i32_0 : i32, i32
  }
  func.func @transform_3(%arg0: i32) -> (i32, i32) {
    %c0_i32 = arith.constant 0 : i32
    %c0_i32_0 = arith.constant 0 : i32
    %c0_i32_1 = arith.constant 0 : i32
    return %c0_i32, %c0_i32_0 : i32, i32
  }
  func.func @transform_4(%arg0: i32) -> (i32, i32) {
    %c0_i32 = arith.constant 0 : i32
    %c0_i32_0 = arith.constant 0 : i32
    %c0_i32_1 = arith.constant 0 : i32
    return %c0_i32, %c0_i32_0 : i32, i32
  }
  func.func @transform_5(%arg0: i32) -> (i32, i32) {
    %c0_i32 = arith.constant 0 : i32
    %c0_i32_0 = arith.constant 0 : i32
    %c0_i32_1 = arith.constant 0 : i32
    return %c0_i32, %c0_i32_0 : i32, i32
  }
  func.func @transform_6(%arg0: i32) -> (i32, i32) {
    %c0_i32 = arith.constant 0 : i32
    %c0_i32_0 = arith.constant 0 : i32
    %c0_i32_1 = arith.constant 0 : i32
    return %c0_i32, %c0_i32_0 : i32, i32
  }
  func.func @transform_7(%arg0: i32) -> (i32, i32) {
    %c0_i32 = arith.constant 0 : i32
    %c0_i32_0 = arith.constant 0 : i32
    %c0_i32_1 = arith.constant 0 : i32
    return %c0_i32, %c0_i32_0 : i32, i32
  }
  func.func @transform_8(%arg0: i32) -> (i32, i32) {
    %c0_i32 = arith.constant 0 : i32
    %c0_i32_0 = arith.constant 0 : i32
    %c0_i32_1 = arith.constant 0 : i32
    return %c0_i32, %c0_i32_0 : i32, i32
  }
  func.func @transform_9(%arg0: i32) -> (i32, i32) {
    %c0_i32 = arith.constant 0 : i32
    %c0_i32_0 = arith.constant 0 : i32
    %c0_i32_1 = arith.constant 0 : i32
    return %c0_i32, %c0_i32_0 : i32, i32
  }
  func.func @transform_10(%arg0: i32) -> (i32, i32) {
    %c0_i32 = arith.constant 0 : i32
    %c0_i32_0 = arith.constant 0 : i32
    %c0_i32_1 = arith.constant 0 : i32
    return %c0_i32, %c0_i32_0 : i32, i32
  }
  func.func @transform_11(%arg0: i32) -> (i32, i32) {
    %c0_i32 = arith.constant 0 : i32
    %c0_i32_0 = arith.constant 0 : i32
    return %c0_i32, %arg0 : i32, i32
  }
}

</mosaic_0001>

<bundles_post_ra>
// kernel: critic_forward.1
= control target key start
LH: loop header
LB: loop body
LE: loop exit
PB: predicated region body
PF: predicated region fallthrough
CT: control target
= control target key end

     0   :  { %vm64_vm0 = vcmask 1043456   ;;  %vm51_vm1 = vcmask 31744   ;;  %vm166_vm2 = vcmask 1041408   ;;  %vm783_vm3 = vmmov 1   ;;  %s977_s1 = inlined_call_operand.vmem [shape: f32[4,8], index: 1, kind: input, shape index: {}]   ;;  %s978_s3 = inlined_call_operand.vmem [shape: f32[32,4], index: 3, kind: input, shape index: {}]   ;;  %s979_s0 = inlined_call_operand.vmem [shape: f32[10,8], index: 0, kind: input, shape index: {}]   ;;  %s980_s10 = inlined_call_operand.<no memory space> [shape: f32[1,1], index: 10, kind: input, shape index: {}]   ;;  %s981_s4 = inlined_call_operand.vmem [shape: f32[32,1], index: 4, kind: input, shape index: {}]   ;;  %s982_s2 = inlined_call_operand.vmem [shape: f32[32,10], index: 2, kind: input, shape index: {}]   ;;  %s983_s6 = inlined_call_operand.vmem [shape: f32[32,1], index: 6, kind: input, shape index: {}]   ;;  %s984_s8 = inlined_call_operand.vmem [shape: f32[32,1], index: 8, kind: input, shape index: {}]   ;;  %s985_s5 = inlined_call_operand.vmem [shape: f32[32,32], index: 5, kind: input, shape index: {}]   ;;  %s986_s7 = inlined_call_operand.vmem [shape: f32[32,32], index: 7, kind: input, shape index: {}]   ;;  %s987_s9 = inlined_call_operand.vmem [shape: f32[1,32], index: 9, kind: input, shape index: {}]   ;;  %s988_s11 = inlined_call_operand.vmem [shape: f32[1,8], index: 11, kind: output, shape index: {}]  }
   0x1   :  { %v50_v0 = vld [vmem:[%s977_s1] sm:$0xf]  ;;  %v47_v2 = vld [vmem:[%s978_s3 + $0x8] sm:$0xff]  ;;  %v16_v3 = vstv %s980_s10  ;;  %vm868_vm4 = vmpackc.low %vm166_vm2, %vm783_vm3  ;;  %v784_v9 = vmov 0   ;;  %vm153_vm5 = vcmask 80896   ;;  %vm315_vm6 = vcmask 261120  }
   0x2   :  { %v46_v1 = vld [vmem:[%s978_s3] sm:$0xff]  ;;  %687 = vmatprep.subr.msk.mxu0 %vm64_vm0, %v50_v0  ;;  %v45_v5 = vld [vmem:[%s979_s0 + $0x8] sm:$0x3]  ;;  %17 = vst [vmem:[#allocation2] sm:$0x1] %v16_v3  ;;  %v48_v8 = vld [vmem:[%s978_s3 + $0x10] sm:$0xff]  ;;  %781 = vset.pattern.permute.xlu0 %v784_v9 }
   0x3   :  { %689 = vmatprep.mubr.msk.f32.mxu0 %vm51_vm1, %v46_v1  ;;  %v44_v4 = vld [vmem:[%s979_s0] sm:$0xff]  ;;  %688 = vmatpush3.msk.msra.mxu0 %vm64_vm0, %v50_v0  ;;  %v49_v10 = vld [vmem:[%s978_s3 + $0x18] sm:$0xff]  ;;  %v257_v12 = vld [vmem:[%s981_s4 + $0x10] sm:$0xff]  ;;  %vm786_vm7 = vmmov 0   ;;  %vm630_vm8 = vcmask 57344  }
   0x4   :  { %v744_v7 = vpack.c.bf16 %v45_v5, %v44_v4  ;;  %690 = vmatmul.mubr.msk.f32.vlgmr.msra.gmra.mrb[0].mxu0 %vm51_vm1, %v47_v2  ;;  %782 = vset.pattern.permute.xlu1 %v784_v9  ;;  %v255_v11 = vld [vmem:[%s981_s4] sm:$0xff]  ;;  %v256_v14 = vld [vmem:[%s981_s4 + $0x8] sm:$0xff]  ;;  %v258_v15 = vld [vmem:[%s981_s4 + $0x18] sm:$0xff]  ;;  %v787_v9 = vmov 0.0  }
   0x5   :  { %692 = vmatprep.mubr.msk.f32.mxu0 %vm51_vm1, %v48_v8  ;;  %v40_v13 = vld [vmem:[%s982_s2] sm:$0xff]  ;;  %261 = vperm.xlu0 %781, %v255_v11   ;;  %v41_v16 = vld [vmem:[%s982_s2 + $0x8] sm:$0xff]  ;;  %v42_v17 = vld [vmem:[%s982_s2 + $0x10] sm:$0xff]  ;;  %v785_v8 = vmov 0.0|0.0  }
   0x6   :  { %746 = vmatprep.subr.msk.bf16.mxu0 %vm868_vm4, %v744_v7  ;;  %271 = vperm.xlu1 %782, %v257_v12   ;;  %v291_v18 = vld [vmem:[%s983_s6] sm:$0xff]  ;;  %v292_v19 = vld [vmem:[%s983_s6 + $0x8] sm:$0xff]  ;;  %v43_v20 = vld [vmem:[%s982_s2 + $0x18] sm:$0xff] }
   0x7   :  { %749 = vmatpush3.bf16.msk.msra.mxu0 %vm868_vm4, %v744_v7  ;;  %v293_v21 = vld [vmem:[%s983_s6 + $0x10] sm:$0xff]  ;;  %v294_v22 = vld [vmem:[%s983_s6 + $0x18] sm:$0xff]  ;;  %v421_v23 = vld [vmem:[%s984_s8] sm:$0xff] }
   0x8   :  { %693 = vmatmul.mubr.msk.f32.gmra.mrb[2].mxu0 %vm51_vm1, %v49_v10  ;;  %v422_v24 = vld [vmem:[%s984_s8 + $0x8] sm:$0xff]  ;;  %v423_v25 = vld [vmem:[%s984_s8 + $0x10] sm:$0xff]  ;;  %v424_v26 = vld [vmem:[%s984_s8 + $0x18] sm:$0xff]  ;;  %766 = vmatprep.subr.bf16.mxu0 %v785_v8 }
   0x9   :  { %699 = vmatprep.mubr.msk.f32.mxu0 %vm153_vm5, %v40_v13  ;;  %266 = vperm.xlu0 %781, %v256_v14   ;;  %v547_v27 = vld [vmem:[#allocation2] sm:$0x1]  ;;  %v288_v47 = vld [vmem:[%s985_s5 + $0x8] sm:$0xff]  ;;  %v289_v48 = vld [vmem:[%s985_s5 + $0x10] sm:$0xff] }
   0xa   :  { %276 = vperm.xlu1 %782, %v258_v15   ;;  %v287_v28 = vld [vmem:[%s985_s5] sm:$0xff]  ;;  %v290_v49 = vld [vmem:[%s985_s5 + $0x18] sm:$0xff]  ;;  %v418_v5 = vld [vmem:[%s986_s7 + $0x8] sm:$0xff] }
   0xb   :  { %713 = vmatprep.mubr.msk.f32.mxu1 %vm315_vm6, %v287_v28  ;;  %v417_v50 = vld [vmem:[%s986_s7] sm:$0xff]  ;;  %v419_v6 = vld [vmem:[%s986_s7 + $0x10] sm:$0xff]  ;;  %v420_v7 = vld [vmem:[%s986_s7 + $0x18] sm:$0xff] }
   0xc   :  { %700 = vmatmul.mubr.msk.f32.vlgmr.msra.gmra.mrb[0].mxu0 %vm153_vm5, %v41_v16  ;;  %v546_v28 = vld [vmem:[%s987_s9] sm:$0x1] }
   0xd   :  { %702 = vmatprep.mubr.msk.f32.mxu0 %vm153_vm5, %v42_v17  ;;  %297 = vperm.xlu0 %781, %v291_v18  }
   0xe   :  { %302 = vperm.xlu1 %782, %v292_v19  }
  0x10   :  { %703 = vmatmul.mubr.msk.f32.gmra.mrb[2].mxu0 %vm153_vm5, %v43_v20 }
  0x11   :  { %307 = vperm.xlu0 %781, %v293_v21   ;;  %741 = vmatprep.mubr.msk.f32.mxu0 %vm786_vm7, %v787_v9 }
  0x12   :  { %312 = vperm.xlu1 %782, %v294_v22  }
  0x15   :  { %427 = vperm.xlu0 %781, %v421_v23  }
  0x16   :  { %432 = vperm.xlu1 %782, %v422_v24  }
  0x19   :  { %437 = vperm.xlu0 %781, %v423_v25  }
  0x1a   :  { %442 = vperm.xlu1 %782, %v424_v26  }
  0x1d   :  { %550 = vperm.xlu0 %781, %v547_v27  }
  0x84   :  { %v262_v29 = vpop.permute.xlu0 %261 }
  0x85   :  { %v272_v30 = vpop.permute.xlu1 %271 }
  0x88   :  { %v267_v31 = vpop.permute.xlu0 %266 }
  0x89   :  { %v277_v37 = vpop.permute.xlu1 %276 }
  0x8c   :  { %v298_v52 = vpop.permute.xlu0 %297 }
  0x8d   :  { %v303_v51 = vpop.permute.xlu1 %302 }
  0x90   :  { %v308_v61 = vpop.permute.xlu0 %307 }
  0x91   :  { %v313_v58 = vpop.permute.xlu1 %312 }
  0x94   :  { %v428_v11 = vpop.permute.xlu0 %427 }
  0x95   :  { %v433_v10 = vpop.permute.xlu1 %432 }
  0x98   :  { %v438_v20 = vpop.permute.xlu0 %437 }
  0x99   :  { %v443_v17 = vpop.permute.xlu1 %442 }
  0xdf   :  { %v701_v32 = vpop.f32.mrb[0].mxu0 }
  0xe0   :  { %v280_v33 = vadd.f32 %v701_v32, %v267_v31  ;;  %v236_v34 = vpop.f32.mrb[1].mxu0  ;;  %v551_v32 = vpop.permute.xlu0 %550 }
  0xe1   :  { %v279_v35 = vadd.f32 %v262_v29, %v236_v34  ;;  %v553_v29 = vlaneseq }
  0xe2   :  { %v284_v36 = vmax.f32 %v280_v33, 0.0 }
  0xe3   :  { %v283_v38 = vmax.f32 %v279_v35, 0.0  ;;  %v704_v39 = vpop.f32.mrb[2].mxu0 }
  0xe4   :  { %v282_v40 = vadd.f32 %v704_v39, %v277_v37  ;;  %v246_v41 = vpop.f32.mrb[3].mxu0 }
  0xe5   :  { %v281_v42 = vadd.f32 %v272_v30, %v246_v41  ;;  %v750_v43 = vpack.c.bf16 %v284_v36, %v283_v38  ;;  %v554_v30 = vshrl.u32 %v553_v29, 7 }
  0xe6   :  { %v286_v44 = vmax.f32 %v282_v40, 0.0 }
  0xe7   :  { %v285_v45 = vmax.f32 %v281_v42, 0.0  ;;  %751 = vmatprep.subr.bf16.mxu1 %v750_v43  ;;  %v555_v31 = vsub.s32 0, %v554_v30 }
  0xe8   :  { %753 = vmatpush3.bf16.msra.mxu1 %v750_v43 }
  0xe9   :  { %v754_v46 = vpack.c.bf16 %v286_v44, %v285_v45  ;;  %v556_v33 = vrot.slane %v551_v32, %v555_v31 }
  0xeb   :  { %755 = vmatprep.subr.bf16.mxu1 %v754_v46 }
  0xec   :  { %757 = vmatpush3.bf16.msra.mxu1 %v754_v46 }
  0xef   :  { %714 = vmatmul.mubr.msk.f32.vlgmr.msra.gmra.mrb[0].mxu1 %vm315_vm6, %v288_v47 }
  0xf0   :  { %716 = vmatprep.mubr.msk.f32.mxu1 %vm315_vm6, %v289_v48 }
  0xf3   :  { %717 = vmatmul.mubr.msk.f32.gmra.mrb[2].mxu1 %vm315_vm6, %v290_v49 }
  0xf4   :  { %727 = vmatprep.mubr.msk.f32.mxu1 %vm315_vm6, %v417_v50 }
 0x1c2   :  { %v715_v53 = vpop.f32.mrb[0].mxu1 }
 0x1c3   :  { %v400_v54 = vadd.f32 %v715_v53, %v303_v51  ;;  %v394_v55 = vpop.f32.mrb[1].mxu1 }
 0x1c4   :  { %v395_v56 = vadd.f32 %v394_v55, %v298_v52 }
 0x1c5   :  { %v414_v57 = vmax.f32 %v400_v54, 0.0 }
 0x1c6   :  { %v413_v59 = vmax.f32 %v395_v56, 0.0  ;;  %v718_v60 = vpop.f32.mrb[2].mxu1 }
 0x1c7   :  { %v410_v62 = vadd.f32 %v718_v60, %v313_v58  ;;  %v404_v63 = vpop.f32.mrb[3].mxu1 }
 0x1c8   :  { %v758_v0 = vpack.c.bf16 %v414_v57, %v413_v59  ;;  %v405_v1 = vadd.f32 %v404_v63, %v308_v61 }
 0x1c9   :  { %v416_v2 = vmax.f32 %v410_v62, 0.0 }
 0x1ca   :  { %v415_v3 = vmax.f32 %v405_v1, 0.0  ;;  %759 = vmatprep.subr.bf16.mxu1 %v758_v0 }
 0x1cb   :  { %761 = vmatpush3.bf16.msra.mxu1 %v758_v0 }
 0x1cc   :  { %v762_v4 = vpack.c.bf16 %v416_v2, %v415_v3 }
 0x1ce   :  { %763 = vmatprep.subr.bf16.mxu1 %v762_v4 }
 0x1cf   :  { %765 = vmatpush3.bf16.msra.mxu1 %v762_v4 }
 0x1d2   :  { %728 = vmatmul.mubr.msk.f32.vlgmr.msra.gmra.mrb[4].mxu1 %vm315_vm6, %v418_v5 }
 0x1d3   :  { %730 = vmatprep.mubr.msk.f32.mxu1 %vm315_vm6, %v419_v6 }
 0x1d6   :  { %731 = vmatmul.mubr.msk.f32.gmra.mrb[6].mxu1 %vm315_vm6, %v420_v7 }
 0x2a5   :  { %v729_v12 = vpop.f32.mrb[4].mxu1 }
 0x2a6   :  { %v529_v13 = vadd.f32 %v729_v12, %v433_v10  ;;  %v523_v14 = vpop.f32.mrb[5].mxu1 }
 0x2a7   :  { %v524_v15 = vadd.f32 %v523_v14, %v428_v11 }
 0x2a8   :  { %v543_v16 = vmax.f32 %v529_v13, 0.0 }
 0x2a9   :  { %v542_v18 = vmax.f32 %v524_v15, 0.0  ;;  %v732_v19 = vpop.f32.mrb[6].mxu1 }
 0x2aa   :  { %v539_v21 = vadd.f32 %v732_v19, %v443_v17  ;;  %v533_v22 = vpop.f32.mrb[7].mxu1 }
 0x2ab   :  { %v767_v23 = vpack.c.bf16 %v543_v16, %v542_v18  ;;  %v534_v24 = vadd.f32 %v533_v22, %v438_v20 }
 0x2ac   :  { %v545_v25 = vmax.f32 %v539_v21, 0.0 }
 0x2ad   :  { %v544_v26 = vmax.f32 %v534_v24, 0.0  ;;  %768 = vmatpush3.bf16.msra.mxu0 %v767_v23 }
 0x2ae   :  { %769 = vmatprep.subr.bf16.mxu0 %v785_v8 }
 0x2af   :  { %v770_v27 = vpack.c.bf16 %v545_v25, %v544_v26 }
 0x2b1   :  { %771 = vmatpush3.bf16.msra.mxu0 %v770_v27 }
 0x2b4   :  { %742 = vmatmul.mubr.msk.f32.vlgmr.msra.gmra.mrb[4].mxu0 %vm315_vm6, %v546_v28 }
 0x387   :  { %v626_v34 = vpop.f32.mrb[4].mxu0 }
 0x388   :  { %v627_v35 = vadd.f32 %v626_v34, %v556_v33  ;;  %v743_v36 = vpop.f32.mrb[5].mxu0 }
 0x38a   :  { %631 = vst.msk [vmem:[%s988_s11] sm:$0x1] %vm630_vm8, %v627_v35 }

</bundles_post_ra>
